<compile_context>
chip_gen: v5e
topology: v5e:2x2
jax: 0.10.0
libtpu: 0.0.40
codegen_flags: <defaults>
</compile_context>

<pallas_src>
import functools

import jax
import jax.numpy as jnp
from jax import lax
from jax.experimental import pallas as pl
from jax.experimental.pallas import tpu as pltpu


def _round_up(x, m):
    return ((x + m - 1) // m) * m


def _triplet_loss_kernel(margin_ref, scores_ref, out_ref,
                         colmax_acc, pos_acc, rowloss_acc,
                         *, n_rows, row_tile, needs_mask):
    i = pl.program_id(0)
    nt = pl.num_programs(0)

    @pl.when(i == 0)
    def _init():
        colmax_acc[...] = jnp.full(colmax_acc.shape, -jnp.inf, jnp.float32)
        pos_acc[...] = jnp.zeros(pos_acc.shape, jnp.float32)
        rowloss_acc[...] = jnp.zeros(rowloss_acc.shape, jnp.float32)

    margin = margin_ref[0]

    s = scores_ref[...].astype(jnp.float32)                 # (TR, N) in VMEM
    tr, n = s.shape

    # Global row index of every element; diagonal mask built once.
    row_ids = lax.broadcasted_iota(jnp.int32, (tr, n), 0) + i * row_tile
    col_ids = lax.broadcasted_iota(jnp.int32, (tr, n), 1)
    diag_mask = col_ids == row_ids

    # One select extracts the diagonal; zero-diagonal matrix by arithmetic
    # (no second full-matrix select) -> matches scores.fill_diagonal_(0).
    diag_vals = jnp.where(diag_mask, s, 0.0)                 # (TR, N)
    s0 = s - diag_vals                                       # (TR, N)

    if needs_mask:
        # Last (partial) row block: padded rows hold unspecified data.
        # Their diagonal column index is >= N, so diag_vals is already 0 there;
        # force them to -inf so they never win a max.
        valid = (lax.broadcasted_iota(jnp.int32, (tr, 1), 0)
                 + i * row_tile) < n_rows                    # (TR, 1)
        s0 = jnp.where(valid, s0, -jnp.inf)

    # positive_scores (row layout) and hardest negative image per caption.
    pos_row = jnp.sum(diag_vals, axis=1, keepdims=True)      # (TR, 1)
    hardest_imgs = jnp.max(s0, axis=1, keepdims=True)        # (TR, 1)

    loss_imgs = jnp.maximum(margin - pos_row + hardest_imgs, 0.0)
    if needs_mask:
        loss_imgs = jnp.where(valid, loss_imgs, 0.0)
    rowloss_acc[...] += loss_imgs

    # Column accumulators (caption side): running col-max and diag in col layout.
    colmax_acc[...] = jnp.maximum(colmax_acc[...],
                                  jnp.max(s0, axis=0, keepdims=True))   # (1, N)
    pos_acc[...] += jnp.sum(diag_vals, axis=0, keepdims=True)           # (1, N)

    @pl.when(i == nt - 1)
    def _finalize():
        loss_caps = jnp.maximum(margin - pos_acc[...] + colmax_acc[...], 0.0)
        total = (jnp.sum(loss_caps, keepdims=True)
                 + jnp.sum(rowloss_acc[...], keepdims=True))            # (1, 1)
        out_ref[...] = total


def triplet_loss(scores, margin, *, row_tile=None):
    """scores: (N, N) float array (any float dtype). Returns scalar loss."""
    n, m = scores.shape
    assert n == m, "scores must be square (no. caps == no. imgs for diag)"

    itemsize = jnp.dtype(scores.dtype).itemsize
    if row_tile is None:
        # Size the double-buffered (TR, N) input slab for the smallest scoped
        # VMEM default (16 MiB on v5e; 32 MiB v6e/v7x): 2 * TR * N * itemsize
        # kept under ~8 MiB, TR a multiple of 8 (f32 sublane), <= 512.
        budget = 8 * 1024 * 1024
        row_tile = budget // (2 * n * itemsize)
        row_tile = int(min(512, row_tile))
    row_tile = min(row_tile, _round_up(n, 8))
    row_tile = max(8, (row_tile // 8) * 8)

    num_tiles = (n + row_tile - 1) // row_tile
    needs_mask = (n % row_tile) != 0

    margin_arr = jnp.asarray([margin], dtype=jnp.float32)   # SMEM scalar input

    kernel = functools.partial(
        _triplet_loss_kernel,
        n_rows=n, row_tile=row_tile, needs_mask=needs_mask)

    out = pl.pallas_call(
        kernel,
        out_shape=jax.ShapeDtypeStruct((1, 1), jnp.float32),
        grid_spec=pltpu.PrefetchScalarGridSpec(
            num_scalar_prefetch=0,
            grid=(num_tiles,),
            in_specs=[
                pl.BlockSpec(memory_space=pltpu.MemorySpace.SMEM),   # margin
                pl.BlockSpec((row_tile, n), lambda i: (i, 0)),       # row slab
            ],
            out_specs=pl.BlockSpec((1, 1), lambda i: (0, 0)),
            scratch_shapes=[
                pltpu.VMEM((1, n), jnp.float32),          # column max
                pltpu.VMEM((1, n), jnp.float32),          # positives (col layout)
                pltpu.VMEM((row_tile, 1), jnp.float32),   # row-loss accumulator
            ]),
        compiler_params=pltpu.CompilerParams(
            dimension_semantics=("arbitrary",)),   # grid axis carries accumulators
    )(margin_arr, scores)
    return out[0, 0]


def _triplet_loss_ref(scores, margin):
    """Pure-JAX reference mirroring the PyTorch code."""
    scores = scores.astype(jnp.float32)
    n = scores.shape[0]
    pos = jnp.diag(scores)
    s0 = jnp.where(jnp.eye(n, dtype=bool), 0.0, scores)
    hardest_imgs = jnp.max(s0, axis=1)
    hardest_caps = jnp.max(s0, axis=0)
    loss_caps = jnp.maximum(margin - pos + hardest_caps, 0.0)
    loss_imgs = jnp.maximum(margin - pos + hardest_imgs, 0.0)
    return jnp.sum(loss_caps) + jnp.sum(loss_imgs)


if __name__ == "__main__":
    key = jax.random.PRNGKey(0)
    margin = 0.2
    k1, k2 = jax.random.split(key)

    # Case 1: N multiple of the row tile (lane-dense, no padding path), grid of 4.
    n1 = 256
    scores1 = jax.random.uniform(k1, (n1, n1), dtype=jnp.float32,
                                 minval=-1.0, maxval=1.0)
    out1 = triplet_loss(scores1, margin, row_tile=64)
    jax.block_until_ready(out1)
    ref1 = _triplet_loss_ref(scores1, margin)
    assert jnp.allclose(out1, ref1, rtol=1e-4, atol=1e-3), (out1, ref1)

    # Case 2: ragged last tile (exercises the padded-row masking).
    n2 = 200
    scores2 = jax.random.uniform(k2, (n2, n2), dtype=jnp.float32,
                                 minval=-1.0, maxval=1.0)
    out2 = triplet_loss(scores2, margin, row_tile=64)
    jax.block_until_ready(out2)
    ref2 = _triplet_loss_ref(scores2, margin)
    assert jnp.allclose(out2, ref2, rtol=1e-4, atol=1e-3), (out2, ref2)

    print("KERNEL_OK")
</pallas_src>

<mosaic_0001>
module attributes {stable_mosaic.version = 11 : i64} {
  func.func @_triplet_loss_kernel(%arg0: i32, %arg1: memref<1xf32, #tpu.memory_space<smem>>, %arg2: memref<64x256xf32, #tpu.memory_space<vmem>>, %arg3: memref<1x1xf32, #tpu.memory_space<vmem>>, %arg4: memref<1x256xf32, #tpu.memory_space<vmem>>, %arg5: memref<1x256xf32, #tpu.memory_space<vmem>>, %arg6: memref<64x1xf32, #tpu.memory_space<vmem>>) attributes {dimension_semantics = [#tpu.dimension_semantics<arbitrary>], iteration_bounds = array<i64: 4>, scalar_prefetch = 0 : i64, scratch_operands = 3 : i64, tpu.core_type = #tpu.core_type<tc>, window_params = [{transform_indices = @transform_0, window_bounds = array<i64: 1>}, {transform_indices = @transform_1, window_bounds = array<i64: 64, 256>}, {pipeline_mode = #tpu.pipeline_mode<synchronous>, transform_indices = @transform_2, window_bounds = array<i64: 1, 1>}]} {
    %c0_i32 = arith.constant 0 : i32
    %0 = arith.cmpi eq, %arg0, %c0_i32 : i32
    %1 = arith.extui %0 : i1 to i32
    %c0_i32_0 = arith.constant 0 : i32
    %2 = arith.cmpi ne, %1, %c0_i32_0 : i32
    scf.if %2 {
      %cst_21 = arith.constant 0xFF800000 : f32
      %39 = vector.broadcast %cst_21 : f32 to vector<1x256xf32>
      %c0_22 = arith.constant 0 : index
      %c0_23 = arith.constant 0 : index
      %40 = vector.load %arg4[%c0_22, %c0_23] : memref<1x256xf32, #tpu.memory_space<vmem>>, vector<1x256xf32>
      tpu.vector_store %arg4[%c0_22, %c0_23], %39 {strides = array<i32>} : memref<1x256xf32, #tpu.memory_space<vmem>>, vector<1x256xf32>,
      %cst_24 = arith.constant 0.000000e+00 : f32
      %41 = vector.broadcast %cst_24 : f32 to vector<1x256xf32>
      %c0_25 = arith.constant 0 : index
      %c0_26 = arith.constant 0 : index
      %42 = vector.load %arg5[%c0_25, %c0_26] : memref<1x256xf32, #tpu.memory_space<vmem>>, vector<1x256xf32>
      tpu.vector_store %arg5[%c0_25, %c0_26], %41 {strides = array<i32>} : memref<1x256xf32, #tpu.memory_space<vmem>>, vector<1x256xf32>,
      %cst_27 = arith.constant 0.000000e+00 : f32
      %43 = vector.broadcast %cst_27 : f32 to vector<64x1xf32>
      %c0_28 = arith.constant 0 : index
      %c0_29 = arith.constant 0 : index
      %44 = vector.load %arg6[%c0_28, %c0_29] : memref<64x1xf32, #tpu.memory_space<vmem>>, vector<64x1xf32>
      tpu.vector_store %arg6[%c0_28, %c0_29], %43 {strides = array<i32>} : memref<64x1xf32, #tpu.memory_space<vmem>>, vector<64x1xf32>,
    } else {
    }
    %c0 = arith.constant 0 : index
    %3 = memref.load %arg1[%c0] : memref<1xf32, #tpu.memory_space<smem>>
    %c0_1 = arith.constant 0 : index
    %c0_2 = arith.constant 0 : index
    %4 = vector.load %arg2[%c0_1, %c0_2] : memref<64x256xf32, #tpu.memory_space<vmem>>, vector<64x256xf32>
    %5 = tpu.iota {dimensions = array<i32: 0>} : vector<64x256xi32>
    %c64_i32 = arith.constant 64 : i32
    %6 = arith.muli %arg0, %c64_i32 : i32
    %7 = vector.broadcast %6 : i32 to vector<64x256xi32>
    %8 = arith.addi %5, %7 : vector<64x256xi32>
    %9 = tpu.iota {dimensions = array<i32: 1>} : vector<64x256xi32>
    %10 = arith.cmpi eq, %9, %8 : vector<64x256xi32>
    %cst = arith.constant 0.000000e+00 : f32
    %11 = vector.broadcast %cst : f32 to vector<64x256xf32>
    %12 = arith.select %10, %4, %11 : vector<64x256xi1>, vector<64x256xf32>
    %13 = arith.subf %4, %12 : vector<64x256xf32>
    %cst_3 = arith.constant dense<0.000000e+00> : vector<64xf32>
    %14 = vector.multi_reduction <add>, %12, %cst_3 [1] : vector<64x256xf32> to vector<64xf32>
    %15 = vector.shape_cast %14 : vector<64xf32> to vector<64x1xf32>
    %cst_4 = arith.constant dense<0xFF800000> : vector<64xf32>
    %16 = vector.multi_reduction <maximumf>, %13, %cst_4 [1] : vector<64x256xf32> to vector<64xf32>
    %17 = vector.shape_cast %16 : vector<64xf32> to vector<64x1xf32>
    %18 = vector.broadcast %3 : f32 to vector<64x1xf32>
    %19 = arith.subf %18, %15 : vector<64x1xf32>
    %20 = arith.addf %19, %17 : vector<64x1xf32>
    %cst_5 = arith.constant 0.000000e+00 : f32
    %21 = vector.broadcast %cst_5 : f32 to vector<64x1xf32>
    %22 = arith.maximumf %20, %21 : vector<64x1xf32>
    %c0_6 = arith.constant 0 : index
    %c0_7 = arith.constant 0 : index
    %23 = vector.load %arg6[%c0_6, %c0_7] : memref<64x1xf32, #tpu.memory_space<vmem>>, vector<64x1xf32>
    %24 = arith.addf %23, %22 : vector<64x1xf32>
    %c0_8 = arith.constant 0 : index
    %c0_9 = arith.constant 0 : index
    %25 = vector.load %arg6[%c0_8, %c0_9] : memref<64x1xf32, #tpu.memory_space<vmem>>, vector<64x1xf32>
    tpu.vector_store %arg6[%c0_8, %c0_9], %24 {strides = array<i32>} : memref<64x1xf32, #tpu.memory_space<vmem>>, vector<64x1xf32>,
    %c0_10 = arith.constant 0 : index
    %c0_11 = arith.constant 0 : index
    %26 = vector.load %arg4[%c0_10, %c0_11] : memref<1x256xf32, #tpu.memory_space<vmem>>, vector<1x256xf32>
    %cst_12 = arith.constant dense<0xFF800000> : vector<256xf32>
    %27 = vector.multi_reduction <maximumf>, %13, %cst_12 [0] : vector<64x256xf32> to vector<256xf32>
    %28 = vector.shape_cast %27 : vector<256xf32> to vector<1x256xf32>
    %29 = arith.maximumf %26, %28 : vector<1x256xf32>
    %c0_13 = arith.constant 0 : index
    %c0_14 = arith.constant 0 : index
    %30 = vector.load %arg4[%c0_13, %c0_14] : memref<1x256xf32, #tpu.memory_space<vmem>>, vector<1x256xf32>
    tpu.vector_store %arg4[%c0_13, %c0_14], %29 {strides = array<i32>} : memref<1x256xf32, #tpu.memory_space<vmem>>, vector<1x256xf32>,
    %c0_15 = arith.constant 0 : index
    %c0_16 = arith.constant 0 : index
    %31 = vector.load %arg5[%c0_15, %c0_16] : memref<1x256xf32, #tpu.memory_space<vmem>>, vector<1x256xf32>
    %cst_17 = arith.constant dense<0.000000e+00> : vector<256xf32>
    %32 = vector.multi_reduction <add>, %12, %cst_17 [0] : vector<64x256xf32> to vector<256xf32>
    %33 = vector.shape_cast %32 : vector<256xf32> to vector<1x256xf32>
    %34 = arith.addf %31, %33 : vector<1x256xf32>
    %c0_18 = arith.constant 0 : index
    %c0_19 = arith.constant 0 : index
    %35 = vector.load %arg5[%c0_18, %c0_19] : memref<1x256xf32, #tpu.memory_space<vmem>>, vector<1x256xf32>
    tpu.vector_store %arg5[%c0_18, %c0_19], %34 {strides = array<i32>} : memref<1x256xf32, #tpu.memory_space<vmem>>, vector<1x256xf32>,
    %c3_i32 = arith.constant 3 : i32
    %36 = arith.cmpi eq, %arg0, %c3_i32 : i32
    %37 = arith.extui %36 : i1 to i32
    %c0_i32_20 = arith.constant 0 : i32
    %38 = arith.cmpi ne, %37, %c0_i32_20 : i32
    scf.if %38 {
      %c0_21 = arith.constant 0 : index
      %c0_22 = arith.constant 0 : index
      %39 = vector.load %arg5[%c0_21, %c0_22] : memref<1x256xf32, #tpu.memory_space<vmem>>, vector<1x256xf32>
      %40 = vector.broadcast %3 : f32 to vector<1x256xf32>
      %41 = arith.subf %40, %39 : vector<1x256xf32>
      %c0_23 = arith.constant 0 : index
      %c0_24 = arith.constant 0 : index
      %42 = vector.load %arg4[%c0_23, %c0_24] : memref<1x256xf32, #tpu.memory_space<vmem>>, vector<1x256xf32>
      %43 = arith.addf %41, %42 : vector<1x256xf32>
      %cst_25 = arith.constant 0.000000e+00 : f32
      %44 = vector.broadcast %cst_25 : f32 to vector<1x256xf32>
      %45 = arith.maximumf %43, %44 : vector<1x256xf32>
      %46 = vector.shape_cast %45 : vector<1x256xf32> to vector<1x1x256xf32>
      %cst_26 = arith.constant dense<0.000000e+00> : vector<1xf32>
      %47 = vector.multi_reduction <add>, %46, %cst_26 [1, 2] : vector<1x1x256xf32> to vector<1xf32>
      %48 = vector.shape_cast %47 : vector<1xf32> to vector<1x1x1xf32>
      %49 = vector.extract %48[0, 0, 0] : f32 from vector<1x1x1xf32>
      %50 = vector.broadcast %49 : f32 to vector<1x1xf32>
      %c0_27 = arith.constant 0 : index
      %c0_28 = arith.constant 0 : index
      %51 = vector.load %arg6[%c0_27, %c0_28] : memref<64x1xf32, #tpu.memory_space<vmem>>, vector<64x1xf32>
      %52 = vector.shape_cast %51 : vector<64x1xf32> to vector<1x64x1xf32>
      %cst_29 = arith.constant dense<0.000000e+00> : vector<1xf32>
      %53 = vector.multi_reduction <add>, %52, %cst_29 [1, 2] : vector<1x64x1xf32> to vector<1xf32>
      %54 = vector.shape_cast %53 : vector<1xf32> to vector<1x1x1xf32>
      %55 = vector.extract %54[0, 0, 0] : f32 from vector<1x1x1xf32>
      %56 = vector.broadcast %55 : f32 to vector<1x1xf32>
      %57 = arith.addf %50, %56 : vector<1x1xf32>
      %c0_30 = arith.constant 0 : index
      %c0_31 = arith.constant 0 : index
      %58 = vector.load %arg3[%c0_30, %c0_31] : memref<1x1xf32, #tpu.memory_space<vmem>>, vector<1x1xf32>
      tpu.vector_store %arg3[%c0_30, %c0_31], %57 {strides = array<i32>} : memref<1x1xf32, #tpu.memory_space<vmem>>, vector<1x1xf32>,
    } else {
    }
    return
  }
  func.func @transform_0(%arg0: i32) -> i32 {
    %c0_i32 = arith.constant 0 : i32
    %c0_i32_0 = arith.constant 0 : i32
    return %c0_i32 : i32
  }
  func.func @transform_1(%arg0: i32) -> (i32, i32) {
    %c0_i32 = arith.constant 0 : i32
    %c0_i32_0 = arith.constant 0 : i32
    return %arg0, %c0_i32 : i32, i32
  }
  func.func @transform_2(%arg0: i32) -> (i32, i32) {
    %c0_i32 = arith.constant 0 : i32
    %c0_i32_0 = arith.constant 0 : i32
    %c0_i32_1 = arith.constant 0 : i32
    return %c0_i32, %c0_i32_0 : i32, i32
  }
}

</mosaic_0001>

<bundles_post_ra>
// kernel: tpu_custom_call.1
= control target key start
LH: loop header
LB: loop body
LE: loop exit
PB: predicated region body
PF: predicated region fallthrough
CT: control target
= control target key end

     0   :  { %s982_s0 = inlined_call_operand.<no memory space> [shape: f32[1], index: 0, kind: input, shape index: {}]   ;;  %s983_s1 = inlined_call_operand.hbm [shape: f32[256,256], index: 1, kind: input, shape index: {}]   ;;  %s984_s2 = inlined_call_operand.hbm [shape: f32[1,1], index: 2, kind: output, shape index: {}]  }
   0x1   :  { %7 = sst [smem:[#allocation5]] %s982_s0 }
   0x2   :  { %8 = vsyncpa [#allocation7], 0 }
   0x3   :  { %10 = vsyncpa [#allocation7 + $0x1], 0 }
   0x4   :  { %11 = vsyncpa [#allocation8], 0  ;;  %s747_s11 = smov 0   ;;  %s749_s12 = smov 0  }
   0x5   :  { %s751_s13 = smov 0   ;;  %s753_s14 = smov 0  }
   0x6 LB: > { %s766_s0 = sadd.s32 4294967295, %s722_s14   ;;  %s769_s15 = sadd.s32 1, %s722_s14   ;;  %s722_s14 = sphi %s753_s14, %s993_s14   ;;  %s718_s13 = sphi %s751_s13, %s992_s13   ;;  %s714_s12 = sphi %s749_s12, %s991_s12   ;;  %s710_s11 = sphi %s747_s11, %s990_s11  }
   0x7   : > { %s42_s16 = ssub.s32 %s722_s14, %s769_s15  ;;  %s45_s17 = sadd.s32 1, %s718_s13 }
   0x8   : > { %p43_p0 = scmp.eq.s32.totalorder %s42_s16, 0  ;;  %p52_p1 = scmp.ne.s32.totalorder %s718_s13, %s714_s12 }
   0x9   : > { %p53_p2 = scmp.eq.s32.totalorder %s722_s14, 0  ;;  %p58_p3 = scmp.ne.s32.totalorder %s714_s12, %s710_s11 }
   0xa   : > { %s779_s18 = scalar_select %p43_p0, %s718_s13, %s45_s17  }
   0xb   : > { %p781_p4 = por %p53_p2, %p52_p1  ;;  %p59_p5 = scmp.eq.s32.totalorder %s766_s0, 0 }
   0xc   : > { %p586_p6 = scmp.lt.s32.totalorder %s722_s14, 4  ;;  %s106_s21 = sand.u32 1, %s718_s13  }
   0xd   : > { %p787_p7 = por %p59_p5, %p58_p3  ;;  %s557_s22 = sshll.u32 %s106_s21, 7 }
   0xe   : > { %s571_s23 = sshll.u32 %s722_s14, 7  ;;  %s110_s27 = scalar_lea.vmem [#allocation6], %s557_s22 }
   0xf   : > { %s116_s26 = scalar_lea.hbm %s983_s1, %s571_s23  ;;  %s119_s28 = sshll.u32 %s110_s27, 4  ;;  %s120_s28 = int_to_ptr.vmem [resolvable:$true] %s119_s28 }
  0x10   : > { %s117_s29 = sshll.u32 %s116_s26, 4  ;;  %p798_p8 = pnand %p586_p6, %p781_p4  ;;  %s118_s29 = int_to_ptr.hbm [resolvable:$true] %s117_s29 }
  0x11   : > { %p561_p9 = scmp.ge.s32.totalorder %s722_s14, 1  ;;  %s107_s3 = scalar_lea.sflag [#allocation7], %s106_s21 }
  0x12   : > { %s626_s4 = sshra.s32 %s118_s29, 4  ;;  %p630_p11 = pneg %p798_p8  ;;  %s627_s4 = int_to_ptr.hbm [resolvable:$true] %s626_s4 }
  0x13   : > { %s628_s5 = scalar_lea.hbm %s627_s4, 128  ;;  %s633_s8 = scalar_lea.hbm %s983_s1, 512 }
  0x14   : > { %p629_p10 = scmp.ne.s32.totalorder %s627_s4, %s628_s5  ;;  %p634_p0 = scmp.lt.s32.totalorder %s627_s4, %s983_s1 }
  0x15   : > { %p635_p1 = scmp.lt.s32.totalorder %s633_s8, %s628_s5 }
  0x16   : > { %p631_p12 = pnand %p630_p11, %p629_p10 }
  0x17   : > { %p636_p2 = por %p635_p1, %p634_p0 }
  0x18   : > { %p632_p13 = pneg %p631_p12 }
  0x1a   : > { %p637_p3 = pnand %p636_p2, %p632_p13 }
  0x1c   : > { %640 = shalt.err (!%p637_p3)
}
  0x1d   : > { %s724_s11 = smov 256   ;;  %s725_s16 = smov 16  }
  0x1e   : > { %585 = dma.hbm_to_vmem [thread:$0]  (!%p798_p8), %s118_s29, 2048, %s120_s28, %s107_s3, %s724_s11, %s724_s11, %s725_s16  }
  0x1f   : > { %p127_p4 = scmp.lt.s32.totalorder %s722_s14, 5 }
  0x21   : > { %p128_p5 = pnand %p561_p9, %p127_p4 }
  0x22   : > { %s133_s17 = sand.u32 (!%p128_p5), 1, %s714_s12  }
  0x23   : > { %131 = sbr.rel (%p128_p5) target bundleno = 439 (0x1b7), region = 28  ;;  %s562_s19 = sshll.u32 (!%p128_p5), %s133_s17, 7 }
  0x24   : > { %s134_s21 = scalar_lea.sflag (!%p128_p5), [#allocation7], %s133_s17  ;;  %s817_s22 = scalar_lea.vmem (!%p128_p5), [#allocation6], %s562_s19 }
  0x28   : > { %701 = dma.done.wait (%p787_p7), %s134_s21, 2048  }
  0x29   : > { %703 = vsyncadd (%p787_p7), %s134_s21, 4294965248  ;;  %p563_p6 = scmp.ne.s32.totalorder %s766_s0, 0 }
  0x2b   : > { %158 = sbr.rel (%p563_p6) target bundleno = 59 (0x3b), region = 36 }
  0x30   : > { %v159_v0 = vlaneseq  ;;  %vm165_vm0 = vcmask 7168   ;;  %v726_v1 = vmov 0.0   ;;  %v727_v2 = vmov -inf  }
  0x31   : > { %166 = vst.msk [vmem:[#allocation4] sm:$0xff] %vm165_vm0, %v726_v1 }
  0x32   : > { %vm161_vm1 = vcmp.lt.s32.totalorder %v159_v0, 256  ;;  %167 = vst.msk [vmem:[#allocation4 + $0x8] sm:$0xff] %vm165_vm0, %v726_v1 }
  0x33   : > { %163 = vst.msk [vmem:[#allocation2] sm:$0x3] %vm161_vm1, %v727_v2 }
  0x34   : > { %164 = vst.msk [vmem:[#allocation3] sm:$0x3] %vm161_vm1, %v726_v1 }
  0x35   : > { %168 = vst.msk [vmem:[#allocation4 + $0x10] sm:$0xff] %vm165_vm0, %v726_v1 }
  0x36   : > { %169 = vst.msk [vmem:[#allocation4 + $0x18] sm:$0xff] %vm165_vm0, %v726_v1 }
  0x37   : > { %170 = vst.msk [vmem:[#allocation4 + $0x20] sm:$0xff] %vm165_vm0, %v726_v1 }
  0x38   : > { %171 = vst.msk [vmem:[#allocation4 + $0x28] sm:$0xff] %vm165_vm0, %v726_v1 }
  0x39   : > { %172 = vst.msk [vmem:[#allocation4 + $0x30] sm:$0xff] %vm165_vm0, %v726_v1 }
  0x3a   : > { %173 = vst.msk [vmem:[#allocation4 + $0x38] sm:$0xff] %vm165_vm0, %v726_v1 }
  0x3b PF: > { %v191_v3 = vlaneseq  ;;  %s564_s14 = sshll.u32 %s766_s0, 6  ;;  %v832_v7 = vld [vmem:[%s817_s22] sm:$0xff]  ;;  %v835_v8 = vld [vmem:[%s817_s22 + $0x8] sm:$0xff]  ;;  %v865_v28 = vld [vmem:[%s817_s22 + $0x10] sm:$0xff]  ;;  %s174_s20 = sld [smem:[#allocation5]] }
  0x3c   : > { %v825_v4 = vstv %s564_s14  ;;  %v844_v17 = vld [vmem:[%s817_s22 + $0x40] sm:$0xff]  ;;  %v847_v18 = vld [vmem:[%s817_s22 + $0x48] sm:$0xff]  ;;  %v868_v29 = vld [vmem:[%s817_s22 + $0x18] sm:$0xff]  ;;  %p565_p7 = scmp.ne.s32.totalorder %s766_s0, 3 }
  0x3d   : > { %v192_v5 = vshrl.u32 %v191_v3, 7  ;;  %v829_v6 = vand.u32 127, %v191_v3  ;;  %v851_v20 = vld [vmem:[%s817_s22 + $0x20] sm:$0xff]  ;;  %v857_v24 = vld [vmem:[%s817_s22 + $0x28] sm:$0xff]  ;;  %v884_v35 = vld [vmem:[%s817_s22 + $0x50] sm:$0xff] }
  0x3e   : > { %v887_v36 = vld [vmem:[%s817_s22 + $0x58] sm:$0xff]  ;;  %v181_v44 = vld [vmem:[%s817_s22 + $0x30] sm:$0xff]  ;;  %v187_v52 = vld [vmem:[%s817_s22 + $0x60] sm:$0xff] }
  0x3f   : > { %v202_v9 = vadd.s32 %v825_v4, %v192_v5  ;;  %v839_v10 = vadd.s32 128, %v829_v6  ;;  %v196_v11 = vadd.s32 32, %v192_v5  ;;  %v194_v12 = vadd.s32 16, %v192_v5  ;;  %v182_v45 = vld [vmem:[%s817_s22 + $0x38] sm:$0xff]  ;;  %v188_v53 = vld [vmem:[%s817_s22 + $0x68] sm:$0xff]  ;;  %v189_v62 = vld [vmem:[%s817_s22 + $0x70] sm:$0xff] }
  0x40   : > { %v193_v13 = vadd.s32 8, %v192_v5  ;;  %v197_v14 = vadd.s32 40, %v192_v5  ;;  %v195_v15 = vadd.s32 24, %v192_v5  ;;  %v198_v16 = vadd.s32 48, %v192_v5  ;;  %v190_v63 = vld [vmem:[%s817_s22 + $0x78] sm:$0xff] }
  0x41   : > { %vm213_vm2 = vcmp.eq.s32.totalorder %v829_v6, %v202_v9  ;;  %vm214_vm3 = vcmp.eq.s32.totalorder %v839_v10, %v202_v9  ;;  %v206_v19 = vadd.s32 %v825_v4, %v196_v11  ;;  %v204_v21 = vadd.s32 %v825_v4, %v194_v12 }
  0x42   : > { %v229_v22 = vsel %vm213_vm2, %v832_v7, 0.0  ;;  %v230_v23 = vsel %vm214_vm3, %v835_v8, 0.0  ;;  %v203_v25 = vadd.s32 %v825_v4, %v193_v13  ;;  %v207_v26 = vadd.s32 %v825_v4, %v197_v14 }
  0x43   : > { %v261_v27 = vadd.f32 %v230_v23, %v229_v22  ;;  %vm221_vm4 = vcmp.eq.s32.totalorder %v829_v6, %v206_v19  ;;  %vm222_vm5 = vcmp.eq.s32.totalorder %v839_v10, %v206_v19  ;;  %vm217_vm6 = vcmp.eq.s32.totalorder %v829_v6, %v204_v21 }
  0x44   : > { %v871_v30 = vsel %vm221_vm4, %v844_v17, 0.0  ;;  %v874_v31 = vsel %vm222_vm5, %v847_v18, 0.0  ;;  %vm218_vm7 = vcmp.eq.s32.totalorder %v839_v10, %v204_v21  ;;  %v233_v32 = vsel %vm217_vm6, %v851_v20, 0.0 }
  0x45   : > { %262 = vadd.xlane.f32.xlu0 %v261_v27  ;;  %v273_v33 = vadd.f32 %v874_v31, %v871_v30  ;;  %v234_v34 = vsel %vm218_vm7, %v857_v24, 0.0  ;;  %vm215_vm8 = vcmp.eq.s32.totalorder %v829_v6, %v203_v25  ;;  %vm216_vm9 = vcmp.eq.s32.totalorder %v839_v10, %v203_v25 }
  0x46   : > { %v267_v37 = vadd.f32 %v234_v34, %v233_v32  ;;  %v231_v38 = vsel %vm215_vm8, %v865_v28, 0.0  ;;  %v232_v39 = vsel %vm216_vm9, %v868_v29, 0.0  ;;  %vm223_vm10 = vcmp.eq.s32.totalorder %v829_v6, %v207_v26 }
  0x47   : > { %274 = vadd.xlane.f32.xlu2 %v273_v33  ;;  %v399_v40 = vadd.f32 %v231_v38, %v229_v22  ;;  %v412_v41 = vadd.f32 %v232_v39, %v230_v23  ;;  %vm224_vm11 = vcmp.eq.s32.totalorder %v839_v10, %v207_v26  ;;  %v239_v42 = vsel %vm223_vm10, %v884_v35, 0.0 }
  0x48   : > { %268 = vadd.xlane.f32.xlu1 %v267_v37  ;;  %v240_v43 = vsel %vm224_vm11, %v887_v36, 0.0  ;;  %v205_v46 = vadd.s32 %v825_v4, %v195_v15  ;;  %v208_v47 = vadd.s32 %v825_v4, %v198_v16  ;;  %v264_v48 = vadd.f32 %v232_v39, %v231_v38 }
  0x49   : > { %v400_v49 = vadd.f32 %v399_v40, %v233_v32  ;;  %v413_v50 = vadd.f32 %v412_v41, %v234_v34  ;;  %v199_v51 = vadd.s32 56, %v192_v5  ;;  %v276_v54 = vadd.f32 %v240_v43, %v239_v42 }
  0x4a   : > { %vm219_vm12 = vcmp.eq.s32.totalorder %v829_v6, %v205_v46  ;;  %vm220_vm13 = vcmp.eq.s32.totalorder %v839_v10, %v205_v46  ;;  %vm225_vm14 = vcmp.eq.s32.totalorder %v829_v6, %v208_v47  ;;  %vm226_vm15 = vcmp.eq.s32.totalorder %v839_v10, %v208_v47 }
  0x4b   : > { %v235_v55 = vsel %vm219_vm12, %v181_v44, 0.0  ;;  %v236_v56 = vsel %vm220_vm13, %v182_v45, 0.0  ;;  %v241_v60 = vsel %vm225_vm14, %v187_v52, 0.0  ;;  %v242_v61 = vsel %vm226_vm15, %v188_v53, 0.0 }
  0x4c   : > { %v270_v57 = vadd.f32 %v236_v56, %v235_v55  ;;  %v401_v58 = vadd.f32 %v400_v49, %v235_v55  ;;  %v414_v59 = vadd.f32 %v413_v50, %v236_v56  ;;  %v209_v0 = vadd.s32 %v825_v4, %v199_v51 }
  0x4d   : > { %265 = vadd.xlane.f32.xlu0 %v264_v48  ;;  %v245_v5 = vsub.f32 %v832_v7, %v229_v22  ;;  %v246_v9 = vsub.f32 %v835_v8, %v230_v23  ;;  %v249_v11 = vsub.f32 %v851_v20, %v233_v32  ;;  %v250_v12 = vsub.f32 %v857_v24, %v234_v34 }
  0x4e   : > { %v402_v1 = vadd.f32 %v401_v58, %v871_v30  ;;  %v415_v2 = vadd.f32 %v414_v59, %v874_v31  ;;  %vm227_vm0 = vcmp.eq.s32.totalorder %v829_v6, %v209_v0  ;;  %vm228_vm1 = vcmp.eq.s32.totalorder %v839_v10, %v209_v0 }
  0x4f   : > { %277 = vadd.xlane.f32.xlu2 %v276_v54  ;;  %v243_v14 = vsel %vm227_vm0, %v189_v62, 0.0  ;;  %v244_v15 = vsel %vm228_vm1, %v190_v63, 0.0  ;;  %v279_v16 = vadd.f32 %v242_v61, %v241_v60  ;;  %v247_v19 = vsub.f32 %v865_v28, %v231_v38 }
  0x50   : > { %271 = vadd.xlane.f32.xlu1 %v270_v57  ;;  %v403_v13 = vadd.f32 %v402_v1, %v239_v42  ;;  %v416_v4 = vadd.f32 %v415_v2, %v240_v43  ;;  %v248_v7 = vsub.f32 %v868_v29, %v232_v39  ;;  %v360_v8 = vmax.f32 %v245_v5, %v249_v11  ;;  %v398_v1 = vld [vmem:[#allocation3] sm:$0x3] }
  0x51   : > { %v373_v6 = vmax.f32 %v246_v9, %v250_v12  ;;  %v251_v23 = vsub.f32 %v181_v44, %v235_v55  ;;  %v282_v10 = vadd.f32 %v244_v15, %v243_v14  ;;  %v285_v25 = vmax.f32 %v245_v5, %v246_v9 }
  0x52   : > { %v404_v21 = vadd.f32 %v403_v13, %v241_v60  ;;  %v417_v22 = vadd.f32 %v416_v4, %v242_v61  ;;  %v252_v20 = vsub.f32 %v182_v45, %v236_v56  ;;  %v254_v24 = vsub.f32 %v847_v18, %v874_v31 }
  0x53   : > { %v361_v32 = vmax.f32 %v247_v19, %v251_v23  ;;  %v253_v33 = vsub.f32 %v844_v17, %v871_v30  ;;  %v255_v34 = vsub.f32 %v884_v35, %v239_v42  ;;  %v256_v37 = vsub.f32 %v887_v36, %v240_v43 }
  0x54   : > { %v405_v26 = vadd.f32 %v404_v21, %v243_v14  ;;  %v418_v27 = vadd.f32 %v417_v22, %v244_v15  ;;  %v374_v28 = vmax.f32 %v248_v7, %v252_v20  ;;  %v375_v29 = vmax.f32 %v373_v6, %v254_v24  ;;  %v359_v22 = vld [vmem:[#allocation2] sm:$0x3] }
  0x55   : > { %280 = vadd.xlane.f32.xlu0 %v279_v16  ;;  %v362_v40 = vmax.f32 %v360_v8, %v253_v33  ;;  %v363_v41 = vmax.f32 %v361_v32, %v255_v34  ;;  %v257_v18 = vsub.f32 %v187_v52, %v241_v60  ;;  %v258_v31 = vsub.f32 %v188_v53, %v242_v61 }
  0x56   : > { %v406_v38 = vrot.slane %v405_v26, 4  ;;  %v419_v39 = vrot.slane %v418_v27, 4  ;;  %v376_v44 = vmax.f32 %v374_v28, %v256_v37  ;;  %v259_v47 = vsub.f32 %v189_v62, %v243_v14 }
  0x57   : > { %286 = vmax.xlane.f32.xlu2 %v285_v25  ;;  %v288_v17 = vmax.f32 %v247_v19, %v248_v7  ;;  %v364_v30 = vmax.f32 %v362_v40, %v257_v18  ;;  %v377_v48 = vmax.f32 %v375_v29, %v258_v31  ;;  %v260_v49 = vsub.f32 %v190_v63, %v244_v15 }
  0x58   : > { %283 = vadd.xlane.f32.xlu1 %v282_v10  ;;  %v407_v45 = vadd.f32 %v406_v38, %v405_v26  ;;  %v420_v46 = vadd.f32 %v419_v39, %v418_v27  ;;  %v365_v42 = vmax.f32 %v363_v41, %v259_v47  ;;  %v294_v36 = vmax.f32 %v251_v23, %v252_v20  ;;  %v334_v39 = vld [vmem:[#allocation4] sm:$0xff] }
  0x59   : > { %v378_v43 = vmax.f32 %v376_v44, %v260_v49  ;;  %v291_v55 = vmax.f32 %v249_v11, %v250_v12  ;;  %vm389_vm2 = vcmask 1040384   ;;  %v297_v63 = vmax.f32 %v253_v33, %v254_v24 }
  0x5a   : > { %v408_v50 = vrot.slane %v407_v45, 2  ;;  %v421_v35 = vrot.slane %v420_v46, 2  ;;  %v366_v56 = vmax.f32 %v364_v30, %v365_v42  ;;  %v303_v9 = vmax.f32 %v257_v18, %v258_v31 }
  0x5b   : > { %v379_v52 = vmax.f32 %v377_v48, %v378_v43  ;;  %vm925_vm3 = vcmp.lt.s32.totalorder %v191_v3, 256  ;;  %v300_v4 = vmax.f32 %v255_v34, %v256_v37  ;;  %v306_v8 = vmax.f32 %v259_v47, %v260_v49  ;;  %v335_v47 = vld [vmem:[#allocation4 + $0x8] sm:$0xff] }
  0x5c   : > { %v409_v51 = vadd.f32 %v408_v50, %v407_v45  ;;  %v422_v54 = vadd.f32 %v421_v35, %v420_v46  ;;  %v367_v58 = vrot.slane %v366_v56, 4  ;;  %v935_v33 = vstv %s174_s20  ;;  %v337_v35 = vld [vmem:[#allocation4 + $0x18] sm:$0xff] }
  0x5d   : > { %289 = vmax.xlane.f32.xlu0 %v288_v17  ;;  %v380_v59 = vrot.slane %v379_v52, 4  ;;  %vm350_vm4 = vcmask 7168  }
  0x5e   : > { %v410_v53 = vrot.slane %v409_v51, 1  ;;  %v423_v57 = vrot.slane %v422_v54, 1  ;;  %v368_v62 = vmax.f32 %v366_v56, %v367_v58 }
  0x5f   : > { %295 = vmax.xlane.f32.xlu2 %v294_v36  ;;  %v381_v0 = vmax.f32 %v379_v52, %v380_v59  ;;  %v336_v36 = vld [vmem:[#allocation4 + $0x10] sm:$0xff]  ;;  %v338_v59 = vld [vmem:[#allocation4 + $0x20] sm:$0xff] }
  0x60   : > { %v411_v60 = vadd.f32 %v410_v53, %v409_v51  ;;  %v424_v61 = vadd.f32 %v423_v57, %v422_v54  ;;  %292 = vmax.xlane.f32.xlu1 %v291_v55  ;;  %v369_v5 = vrot.slane %v368_v62, 2 }
  0x61   : > { %v382_v11 = vrot.slane %v381_v0, 2 }
  0x62   : > { %v427_v2 = vrot.slane %v424_v61, 7  ;;  %v370_v14 = vmax.f32 %v368_v62, %v369_v5  ;;  %v339_v5 = vld [vmem:[#allocation4 + $0x28] sm:$0xff] }
  0x63   : > { %v383_v16 = vmax.f32 %v381_v0, %v382_v11 }
  0x64   : > { %v428_v13 = vsel %vm389_vm2, %v411_v60, %v427_v2  ;;  %v371_v19 = vrot.slane %v370_v14, 1 }
  0x65   : > { %v430_v15 = vadd.f32 %v428_v13, %v398_v1  ;;  %298 = vmax.xlane.f32.xlu0 %v297_v63  ;;  %v384_v7 = vrot.slane %v383_v16, 1  ;;  %v340_v1 = vld [vmem:[#allocation4 + $0x30] sm:$0xff] }
  0x66   : > { %v372_v3 = vmax.f32 %v370_v14, %v371_v19 }
  0x67   : > { %431 = vst.msk [vmem:[#allocation3] sm:$0x3] %vm925_vm3, %v430_v15  ;;  %304 = vmax.xlane.f32.xlu2 %v303_v9  ;;  %v385_v21 = vmax.f32 %v383_v16, %v384_v7  ;;  %v341_v16 = vld [vmem:[#allocation4 + $0x38] sm:$0xff] }
  0x68   : > { %301 = vmax.xlane.f32.xlu1 %v300_v4 }
  0x69   : > { %v388_v6 = vrot.slane %v385_v21, 7 }
  0x6b   : > { %v390_v23 = vsel %vm389_vm2, %v372_v3, %v388_v6 }
  0x6c   : > { %v392_v10 = vmax.f32 %v359_v22, %v390_v23 }
  0x6d   : > { %307 = vmax.xlane.f32.xlu0 %v306_v8 }
  0x6e   : > { %397 = vst.msk [vmem:[#allocation2] sm:$0x3] %vm925_vm3, %v392_v10 }
  0xb8   : > { %v263_v25 = vpop.xlane.xlu0 %262 }
  0xb9   : > { %v310_v29 = vsub.f32 %v935_v33, %v263_v25 }
  0xba   : > { %v275_v20 = vpop.xlane.xlu2 %274 }
  0xbb   : > { %v269_v24 = vpop.xlane.xlu1 %268  ;;  %v314_v54 = vsub.f32 %v935_v33, %v275_v20 }
  0xbc   : > { %v312_v46 = vsub.f32 %v935_v33, %v269_v24 }
  0xc0   : > { %v266_v26 = vpop.xlane.xlu0 %265 }
  0xc1   : > { %v311_v41 = vsub.f32 %v935_v33, %v266_v26 }
  0xc2   : > { %v278_v27 = vpop.xlane.xlu2 %277 }
  0xc3   : > { %v272_v32 = vpop.xlane.xlu1 %271  ;;  %v315_v58 = vsub.f32 %v935_v33, %v278_v27 }
  0xc4   : > { %v313_v31 = vsub.f32 %v935_v33, %v272_v32 }
  0xc8   : > { %v281_v28 = vpop.xlane.xlu0 %280 }
  0xc9   : > { %v316_v53 = vsub.f32 %v935_v33, %v281_v28 }
  0xca   : > { %v287_v34 = vpop.xlane.xlu2 %286 }
  0xcb   : > { %v284_v37 = vpop.xlane.xlu1 %283  ;;  %v318_v38 = vadd.f32 %v310_v29, %v287_v34 }
  0xcc   : > { %v317_v12 = vsub.f32 %v935_v33, %v284_v37 }
  0xcd   : > { %v326_v40 = vmax.f32 %v318_v38, 0.0 }
  0xcf   : > { %v342_v44 = vadd.f32 %v334_v39, %v326_v40 }
  0xd0   : > { %v290_v18 = vpop.xlane.xlu0 %289 }
  0xd1   : > { %351 = vst.msk [vmem:[#allocation4] sm:$0xff] %vm350_vm4, %v342_v44  ;;  %v319_v45 = vadd.f32 %v311_v41, %v290_v18 }
  0xd2   : > { %v296_v17 = vpop.xlane.xlu2 %295 }
  0xd3   : > { %v327_v30 = vmax.f32 %v319_v45, 0.0  ;;  %v293_v48 = vpop.xlane.xlu1 %292  ;;  %v321_v49 = vadd.f32 %v313_v31, %v296_v17 }
  0xd4   : > { %v320_v50 = vadd.f32 %v312_v46, %v293_v48 }
  0xd5   : > { %v343_v42 = vadd.f32 %v335_v47, %v327_v30  ;;  %v329_v43 = vmax.f32 %v321_v49, 0.0 }
  0xd6   : > { %v328_v51 = vmax.f32 %v320_v50, 0.0 }
  0xd7   : > { %352 = vst.msk [vmem:[#allocation4 + $0x8] sm:$0xff] %vm350_vm4, %v343_v42  ;;  %v345_v55 = vadd.f32 %v337_v35, %v329_v43 }
  0xd8   : > { %v344_v56 = vadd.f32 %v336_v36, %v328_v51  ;;  %v299_v52 = vpop.xlane.xlu0 %298 }
  0xd9   : > { %354 = vst.msk [vmem:[#allocation4 + $0x18] sm:$0xff] %vm350_vm4, %v345_v55  ;;  %v322_v57 = vadd.f32 %v314_v54, %v299_v52 }
  0xda   : > { %353 = vst.msk [vmem:[#allocation4 + $0x10] sm:$0xff] %vm350_vm4, %v344_v56  ;;  %v305_v60 = vpop.xlane.xlu2 %304 }
  0xdb   : > { %v330_v61 = vmax.f32 %v322_v57, 0.0  ;;  %v302_v62 = vpop.xlane.xlu1 %301  ;;  %v324_v63 = vadd.f32 %v316_v53, %v305_v60 }
  0xdc   : > { %v323_v0 = vadd.f32 %v315_v58, %v302_v62 }
  0xdd   : > { %v346_v2 = vadd.f32 %v338_v59, %v330_v61  ;;  %v332_v9 = vmax.f32 %v324_v63, 0.0 }
  0xde   : > { %v331_v11 = vmax.f32 %v323_v0, 0.0 }
  0xdf   : > { %355 = vst.msk [vmem:[#allocation4 + $0x20] sm:$0xff] %vm350_vm4, %v346_v2  ;;  %v348_v13 = vadd.f32 %v340_v1, %v332_v9 }
  0xe0   : > { %v347_v4 = vadd.f32 %v339_v5, %v331_v11  ;;  %v308_v14 = vpop.xlane.xlu0 %307 }
  0xe1   : > { %357 = vst.msk [vmem:[#allocation4 + $0x30] sm:$0xff] %vm350_vm4, %v348_v13  ;;  %v325_v15 = vadd.f32 %v317_v12, %v308_v14 }
  0xe2   : > { %356 = vst.msk [vmem:[#allocation4 + $0x28] sm:$0xff] %vm350_vm4, %v347_v4 }
  0xe3   : > { %v333_v19 = vmax.f32 %v325_v15, 0.0  ;;  %435 = sbr.rel (%p565_p7) target bundleno = 434 (0x1b2), region = 40 }
  0xe5   : > { %v349_v7 = vadd.f32 %v341_v16, %v333_v19 }
  0xe7   : > { %358 = vst.msk [vmem:[#allocation4 + $0x38] sm:$0xff] %vm350_vm4, %v349_v7 }
  0xe8   : > { %v436_v8 = vld [vmem:[#allocation3] sm:$0x3]  ;;  %v438_v21 = vld [vmem:[#allocation2] sm:$0x3]  ;;  %v459_v3 = vld [vmem:[#allocation4] sm:$0xff]  ;;  %vm493_vm5 = vcmask 0  }
  0xe9   : > { %v437_v22 = vsub.f32 %v935_v33, %v436_v8  ;;  %v460_v6 = vld [vmem:[#allocation4 + $0x8] sm:$0xff]  ;;  %v461_v23 = vld [vmem:[#allocation4 + $0x10] sm:$0xff]  ;;  %v462_v10 = vld [vmem:[#allocation4 + $0x18] sm:$0xff]  ;;  %v467_v25 = vsel %vm350_vm4, %v459_v3, 0.0 }
  0xea   : > { %v468_v20 = vsel %vm350_vm4, %v460_v6, 0.0  ;;  %v470_v24 = vsel %vm350_vm4, %v461_v23, 0.0  ;;  %v463_v27 = vld [vmem:[#allocation4 + $0x20] sm:$0xff]  ;;  %v472_v28 = vsel %vm350_vm4, %v462_v10, 0.0  ;;  %v464_v34 = vld [vmem:[#allocation4 + $0x28] sm:$0xff]  ;;  %v465_v40 = vld [vmem:[#allocation4 + $0x30] sm:$0xff] }
  0xeb   : > { %v439_v26 = vadd.f32 %v438_v21, %v437_v22  ;;  %v469_v32 = vadd.f32 %v468_v20, %v467_v25  ;;  %v474_v38 = vsel %vm350_vm4, %v463_v27, 0.0  ;;  %v476_v44 = vsel %vm350_vm4, %v464_v34, 0.0 }
  0xec   : > { %v478_v17 = vsel %vm350_vm4, %v465_v40, 0.0 }
  0xed   : > { %v440_v29 = vmax.f32 %v439_v26, 0.0  ;;  %v471_v37 = vadd.f32 %v470_v24, %v469_v32 }
  0xee   : > { %v466_v47 = vld [vmem:[#allocation4 + $0x38] sm:$0xff] }
  0xef   : > { %v442_v33 = vperm.slane %v440_v29, 0  ;;  %v443_v39 = vperm.slane %v440_v29, 1  ;;  %v473_v41 = vadd.f32 %v472_v28, %v471_v37  ;;  %v480_v49 = vsel %vm350_vm4, %v466_v47, 0.0 }
  0xf1   : > { %v446_v18 = vsel %vm389_vm2, %v442_v33, 0.0  ;;  %v447_v31 = vsel %vm389_vm2, %v443_v39, 0.0  ;;  %v475_v45 = vadd.f32 %v474_v38, %v473_v41 }
  0xf2   : > { %v448_v46 = vadd.f32 %v447_v31, %v446_v18 }
  0xf3   : > { %v477_v30 = vadd.f32 %v476_v44, %v475_v45 }
  0xf4   : > { %449 = vadd.xlane.f32.xlu0 %v448_v46 }
  0xf5   : > { %v479_v48 = vadd.f32 %v478_v17, %v477_v30 }
  0xf7   : > { %v481_v50 = vadd.f32 %v480_v49, %v479_v48 }
  0xfc   : > { %482 = vadd.xlane.f32.xlu0 %v481_v50 }
 0x167   : > { %v450_v35 = vpop.xlane.xlu0 %449 }
 0x168   : > { %v451_v42 = vrot.slane %v450_v35, 4 }
 0x16a   : > { %v452_v36 = vadd.f32 %v451_v42, %v450_v35 }
 0x16c   : > { %v453_v43 = vrot.slane %v452_v36, 2 }
 0x16e   : > { %v454_v51 = vadd.f32 %v453_v43, %v452_v36 }
 0x16f   : > { %v483_v54 = vpop.xlane.xlu0 %482 }
 0x170   : > { %v484_v55 = vrot.slane %v483_v54, 4  ;;  %v455_v56 = vrot.slane %v454_v51, 1 }
 0x172   : > { %v485_v52 = vadd.f32 %v484_v55, %v483_v54  ;;  %v456_v53 = vadd.f32 %v455_v56, %v454_v51 }
 0x174   : > { %v486_v57 = vrot.slane %v485_v52, 2  ;;  %572 = vpush %v456_v53 }
 0x176   : > { %v487_v58 = vadd.f32 %v486_v57, %v485_v52 }
 0x178   : > { %v488_v59 = vrot.slane %v487_v58, 1 }
 0x17a   : > { %v489_v60 = vadd.f32 %v488_v59, %v487_v58 }
 0x17c   : > { %574 = vpush %v489_v60 }
 0x1a5   : > { %s573_s23 = spop %572 }
 0x1a6   : > { %v458_v61 = vstv %s573_s23 }
 0x1ad   : > { %s575_s24 = spop %574 }
 0x1ae   : > { %v491_v62 = vstv %s575_s24 }
 0x1af   : > { %v492_v63 = vadd.f32 %v491_v62, %v458_v61 }
 0x1b1   : > { %494 = vst.msk [vmem:[#allocation9] sm:$0x1] %vm493_vm5, %v492_v63 }
 0x1b2 PF: > { %p587_p8 = scmp.eq.s32.totalorder %s766_s0, 3  ;;  %s728_s25 = smov [#allocation9]  }
 0x1b3   : > { %s501_s26 = sshll.u32 %s728_s25, 4  ;;  %s503_s29 = sshll.u32 %s984_s2, 4  ;;  %s502_s26 = int_to_ptr.vmem [resolvable:$true] %s501_s26  ;;  %s504_s29 = int_to_ptr.hbm [resolvable:$true] %s503_s29 }
 0x1b4   : > { %579 = dma.vmem_to_hbm [thread:$0]  (%p587_p8), %s502_s26, 16, %s504_s29, [#allocation8]  }
 0x1b5   : > { %705 = dma.done.wait (%p587_p8), [#allocation8], 16  }
 0x1b6   : > { %707 = vsyncadd (%p587_p8), [#allocation8], 4294967280 }
 0x1b7 PF: > { %p14_p9 = scmp.ge.s32.totalorder %s769_s15, 6   ;;  %s990_s11 = smov %s714_s12 }
 0x1b8   : > { %s991_s12 = smov %s718_s13  ;;  %s992_s13 = smov %s779_s18 }
 0x1b9   : > { %s993_s14 = smov %s769_s15  ;;  %16 = sbr.rel (!%p14_p9) target bundleno = 6 (0x6), region = 73 }
 0x1be   :  { %517 = vsyncpa [#allocation7], 1 }
 0x1bf   :  { %519 = vsyncpa [#allocation7 + $0x1], 1 }
 0x1c0   :  { %520 = vsyncpa [#allocation8], 1 }
 0x1c1   :  { %522 = vsyncpa [#allocation8 + $0x1], 1 }

</bundles_post_ra>
